<compile_context>
chip_gen: v5e
topology: v5e:2x2
jax: 0.10.0
libtpu: 0.0.40
codegen_flags: <defaults>
</compile_context>

<pallas_src>
import functools

import jax
import jax.numpy as jnp
from jax import lax
from jax.experimental import pallas as pl
from jax.experimental.pallas import tpu as pltpu


def _round_up(a: int, b: int) -> int:
    return ((a + b - 1) // b) * b


def _make_dice_sums_kernel(n_valid: int, tile_r: int, lane_c: int,
                           needs_mask: bool):
    """Per-chunk partial sums for the 6 dice reductions.

    Inputs per grid step:
      x_ref: (2, tile_r, lane_c)  log-probs, x_ref[c] = log p(class c)
      t_ref: (tile_r, lane_c)     targets (class-1 indicator / real valued)
    Output per grid step:
      o_ref: (1, 8, lane_c)       rows = [inter0, inter1, A0, A1, B0, B1, 0, 0]
                                  summed over the rows of the block (lane-partials)
    """

    def kernel(x_ref, t_ref, o_ref):
        x0 = x_ref[0].astype(jnp.float32)          # (tile_r, lane_c)
        x1 = x_ref[1].astype(jnp.float32)
        t1 = t_ref[...].astype(jnp.float32)

        p0 = jnp.exp(x0)                           # EUP
        p1 = jnp.exp(x1)
        t0 = 1.0 - t1

        if needs_mask:
            # Only the padded tail (flat index >= n_valid) must be zeroed.
            i = pl.program_id(0)
            row = lax.broadcasted_iota(jnp.int32, (tile_r, lane_c), 0)
            lane = lax.broadcasted_iota(jnp.int32, (tile_r, lane_c), 1)
            flat = (i * tile_r + row) * lane_c + lane
            m = (flat < n_valid).astype(jnp.float32)
            p0 = p0 * m
            p1 = p1 * m
            t0 = t0 * m
            t1 = t1 * m

        def rsum(q):
            # Reduce over rows only (mostly VALU vreg adds); keep lanes dense.
            return jnp.sum(q, axis=0, keepdims=True)   # (1, lane_c)

        zero = jnp.zeros((1, lane_c), jnp.float32)
        partial = jnp.concatenate(
            [rsum(p0 * t0), rsum(p1 * t1),      # intersections
             rsum(p0 * p0), rsum(p1 * p1),      # A sums
             rsum(t0 * t0), rsum(t1 * t1),      # B sums
             zero, zero],                       # pad to 8 sublanes
            axis=0)                              # (8, lane_c)

        o_ref[0] = partial

    return kernel


def _dice_partial_sums(x, t):
    """Returns the 6 global sums (inter0, inter1, A0, A1, B0, B1)."""
    n = x.shape[0]

    lane_c = 512 if n >= 512 else 128
    m_needed = -(-n // lane_c)
    tile_r = min(512, _round_up(max(m_needed, 1), 8))
    m_pad = _round_up(m_needed, tile_r)
    n_pad = m_pad * lane_c
    n_chunks = m_pad // tile_r

    # Layout plumbing (XLA side): (N, 2) -> (2, M_pad, C) lane-dense slabs.
    x_t = jnp.transpose(x.astype(jnp.float32))                    # (2, N)
    x_t = jnp.pad(x_t, ((0, 0), (0, n_pad - n)))
    x3 = x_t.reshape(2, m_pad, lane_c)
    t2 = jnp.pad(t.astype(jnp.float32), (0, n_pad - n)).reshape(m_pad, lane_c)

    kernel = _make_dice_sums_kernel(n, tile_r, lane_c,
                                    needs_mask=(n_pad != n))

    partials = pl.pallas_call(
        kernel,
        out_shape=jax.ShapeDtypeStruct((n_chunks, 8, lane_c), jnp.float32),
        grid_spec=pltpu.PrefetchScalarGridSpec(
            num_scalar_prefetch=0,
            grid=(n_chunks,),
            in_specs=[
                pl.BlockSpec((2, tile_r, lane_c), lambda i: (0, i, 0)),
                pl.BlockSpec((tile_r, lane_c), lambda i: (i, 0)),
            ],
            out_specs=pl.BlockSpec((1, 8, lane_c), lambda i: (i, 0, 0)),
        ),
        compiler_params=pltpu.CompilerParams(
            dimension_semantics=("parallel",)),   # no carried state -> megacore OK
    )(x3, t2)

    sums = jnp.sum(partials, axis=(0, 2))          # (8,) tiny final reduce in JAX
    return sums[0], sums[1], sums[2], sums[3], sums[4], sums[5]


@functools.partial(jax.jit, static_argnames=("class_weights", "epsilon"))
def dice_loss(inputs, targets, class_weights=(0.0, 1.0), epsilon=1e-15):
    """Pallas implementation of DiceLoss.forward (inputs are log-probs, (N, 2))."""
    x = inputs.astype(jnp.float32)
    t = targets.astype(jnp.float32).reshape(-1)
    assert x.ndim == 2 and x.shape[1] == 2, "expected (N, 2) log-prob inputs"
    assert t.shape[0] == x.shape[0]

    inter0, inter1, a0, a1, b0, b1 = _dice_partial_sums(x, t)

    # Final dice formula: 6 scalars -> scalar, done in JAX (no Pallas win here).
    dice0 = (2.0 * inter0 + epsilon) / (a0 + b0 + epsilon)
    dice1 = (2.0 * inter1 + epsilon) / (a1 + b1 + epsilon)
    w0, w1 = class_weights
    return 1.0 - (dice0 * w0 + dice1 * w1)


class DiceLoss:
    """Config-holding wrapper mirroring the PyTorch module (no parameters)."""

    def __init__(self, loss_weight_dictionary=None):
        self.class_weights = (0.0, 1.0)
        self.epsilon = 1e-15
        if loss_weight_dictionary and "dice" in loss_weight_dictionary:
            d = loss_weight_dictionary["dice"]
            if "class_weights" in d:
                self.class_weights = tuple(float(w) for w in d["class_weights"])
            if "epsilon" in d:
                self.epsilon = float(d["epsilon"])

    def __call__(self, inputs, targets):
        return dice_loss(inputs, targets,
                         class_weights=self.class_weights,
                         epsilon=self.epsilon)


def _reference_dice_loss(inputs, targets, class_weights=(0.0, 1.0),
                         epsilon=1e-15):
    """Pure-JAX transcription of the PyTorch reference."""
    pred = jnp.exp(inputs.astype(jnp.float32))                  # (N, 2)
    t = targets.astype(jnp.float32).reshape(-1)
    target_hot = jnp.stack([1.0 - t, t], axis=1)                # (N, 2)
    intersection = jnp.sum(pred * target_hot, axis=0)
    a_sum = jnp.sum(pred * pred, axis=0)
    b_sum = jnp.sum(target_hot * target_hot, axis=0)
    dice = (2.0 * intersection + epsilon) / (a_sum + b_sum + epsilon)
    return 1.0 - (dice[0] * class_weights[0] + dice[1] * class_weights[1])


if __name__ == "__main__":
    key = jax.random.PRNGKey(0)
    k1, k2 = jax.random.split(key)

    # Small but non-trivial: N is NOT a multiple of 128 to exercise the
    # padding / in-kernel mask path.
    N = 2000
    logits = jax.random.normal(k1, (N, 2), dtype=jnp.float32)
    inputs = jax.nn.log_softmax(logits, axis=-1)     # model head outputs log-probs
    targets = (jax.random.uniform(k2, (N,)) < 0.3).astype(jnp.float32)

    ok = True
    for cw in ((0.0, 1.0), (0.3, 0.7)):
        loss_mod = DiceLoss({"dice": {"class_weights": list(cw),
                                      "epsilon": 1e-15}})
        out = jax.block_until_ready(loss_mod(inputs, targets))
        ref = _reference_dice_loss(inputs, targets, cw, 1e-15)
        if not jnp.allclose(out, ref, rtol=1e-5, atol=1e-6):
            ok = False
            print(f"MISMATCH class_weights={cw}: {out} vs {ref}")

    if ok:
        print("KERNEL_OK")
</pallas_src>

<mosaic_0001>
module attributes {stable_mosaic.version = 11 : i64} {
  func.func @kernel(%arg0: i32, %arg1: memref<2x8x512xf32, #tpu.memory_space<vmem>>, %arg2: memref<8x512xf32, #tpu.memory_space<vmem>>, %arg3: memref<1x8x512xf32, #tpu.memory_space<vmem>>) attributes {dimension_semantics = [#tpu.dimension_semantics<parallel>], iteration_bounds = array<i64: 1>, scalar_prefetch = 0 : i64, scratch_operands = 0 : i64, tpu.core_type = #tpu.core_type<tc>, window_params = [{transform_indices = @transform_0, window_bounds = array<i64: 2, 8, 512>}, {transform_indices = @transform_1, window_bounds = array<i64: 8, 512>}, {transform_indices = @transform_2, window_bounds = array<i64: 1, 8, 512>}]} {
    %c0 = arith.constant 0 : index
    %c0_0 = arith.constant 0 : index
    %c0_1 = arith.constant 0 : index
    %0 = vector.load %arg1[%c0, %c0_0, %c0_1] : memref<2x8x512xf32, #tpu.memory_space<vmem>>, vector<1x8x512xf32>
    %1 = vector.shape_cast %0 : vector<1x8x512xf32> to vector<8x512xf32>
    %c1 = arith.constant 1 : index
    %c0_2 = arith.constant 0 : index
    %c0_3 = arith.constant 0 : index
    %2 = vector.load %arg1[%c1, %c0_2, %c0_3] : memref<2x8x512xf32, #tpu.memory_space<vmem>>, vector<1x8x512xf32>
    %3 = vector.shape_cast %2 : vector<1x8x512xf32> to vector<8x512xf32>
    %c0_4 = arith.constant 0 : index
    %c0_5 = arith.constant 0 : index
    %4 = vector.load %arg2[%c0_4, %c0_5] : memref<8x512xf32, #tpu.memory_space<vmem>>, vector<8x512xf32>
    %5 = math.exp %1 : vector<8x512xf32>
    %6 = math.exp %3 : vector<8x512xf32>
    %cst = arith.constant 1.000000e+00 : f32
    %7 = vector.broadcast %cst : f32 to vector<8x512xf32>
    %8 = arith.subf %7, %4 : vector<8x512xf32>
    %9 = tpu.iota {dimensions = array<i32: 0>} : vector<8x512xi32>
    %10 = tpu.iota {dimensions = array<i32: 1>} : vector<8x512xi32>
    %c8_i32 = arith.constant 8 : i32
    %11 = arith.muli %arg0, %c8_i32 : i32
    %12 = vector.broadcast %11 : i32 to vector<8x512xi32>
    %13 = arith.addi %12, %9 : vector<8x512xi32>
    %c512_i32 = arith.constant 512 : i32
    %14 = vector.broadcast %c512_i32 : i32 to vector<8x512xi32>
    %15 = arith.muli %13, %14 : vector<8x512xi32>
    %16 = arith.addi %15, %10 : vector<8x512xi32>
    %c2000_i32 = arith.constant 2000 : i32
    %17 = vector.broadcast %c2000_i32 : i32 to vector<8x512xi32>
    %18 = arith.cmpi slt, %16, %17 : vector<8x512xi32>
    %19 = arith.extui %18 : vector<8x512xi1> to vector<8x512xi32>
    %20 = arith.sitofp %19 : vector<8x512xi32> to vector<8x512xf32>
    %21 = arith.mulf %5, %20 : vector<8x512xf32>
    %22 = arith.mulf %6, %20 : vector<8x512xf32>
    %23 = arith.mulf %8, %20 : vector<8x512xf32>
    %24 = arith.mulf %4, %20 : vector<8x512xf32>
    %cst_6 = arith.constant 0.000000e+00 : f32
    %25 = vector.broadcast %cst_6 : f32 to vector<1x512xf32>
    %26 = arith.mulf %21, %23 : vector<8x512xf32>
    %cst_7 = arith.constant dense<0.000000e+00> : vector<512xf32>
    %27 = vector.multi_reduction <add>, %26, %cst_7 [0] : vector<8x512xf32> to vector<512xf32>
    %28 = vector.shape_cast %27 : vector<512xf32> to vector<1x512xf32>
    %29 = arith.mulf %22, %24 : vector<8x512xf32>
    %cst_8 = arith.constant dense<0.000000e+00> : vector<512xf32>
    %30 = vector.multi_reduction <add>, %29, %cst_8 [0] : vector<8x512xf32> to vector<512xf32>
    %31 = vector.shape_cast %30 : vector<512xf32> to vector<1x512xf32>
    %32 = arith.mulf %21, %21 : vector<8x512xf32>
    %cst_9 = arith.constant dense<0.000000e+00> : vector<512xf32>
    %33 = vector.multi_reduction <add>, %32, %cst_9 [0] : vector<8x512xf32> to vector<512xf32>
    %34 = vector.shape_cast %33 : vector<512xf32> to vector<1x512xf32>
    %35 = arith.mulf %22, %22 : vector<8x512xf32>
    %cst_10 = arith.constant dense<0.000000e+00> : vector<512xf32>
    %36 = vector.multi_reduction <add>, %35, %cst_10 [0] : vector<8x512xf32> to vector<512xf32>
    %37 = vector.shape_cast %36 : vector<512xf32> to vector<1x512xf32>
    %38 = arith.mulf %23, %23 : vector<8x512xf32>
    %cst_11 = arith.constant dense<0.000000e+00> : vector<512xf32>
    %39 = vector.multi_reduction <add>, %38, %cst_11 [0] : vector<8x512xf32> to vector<512xf32>
    %40 = vector.shape_cast %39 : vector<512xf32> to vector<1x512xf32>
    %41 = arith.mulf %24, %24 : vector<8x512xf32>
    %cst_12 = arith.constant dense<0.000000e+00> : vector<512xf32>
    %42 = vector.multi_reduction <add>, %41, %cst_12 [0] : vector<8x512xf32> to vector<512xf32>
    %43 = vector.shape_cast %42 : vector<512xf32> to vector<1x512xf32>
    %44 = tpu.concatenate %28, %31, %34, %37, %40, %43, %25, %25 in 0 : vector<1x512xf32>, vector<1x512xf32>, vector<1x512xf32>, vector<1x512xf32>, vector<1x512xf32>, vector<1x512xf32>, vector<1x512xf32>, vector<1x512xf32> -> vector<8x512xf32>
    %c0_13 = arith.constant 0 : index
    %c0_14 = arith.constant 0 : index
    %c0_15 = arith.constant 0 : index
    %45 = vector.load %arg3[%c0_13, %c0_14, %c0_15] : memref<1x8x512xf32, #tpu.memory_space<vmem>>, vector<1x8x512xf32>
    %46 = vector.shape_cast %45 : vector<1x8x512xf32> to vector<8x512xf32>
    %47 = vector.shape_cast %44 : vector<8x512xf32> to vector<1x8x512xf32>
    tpu.vector_store %arg3[%c0_13, %c0_14, %c0_15], %47 {strides = array<i32>} : memref<1x8x512xf32, #tpu.memory_space<vmem>>, vector<1x8x512xf32>,
    return
  }
  func.func @transform_0(%arg0: i32) -> (i32, i32, i32) {
    %c0_i32 = arith.constant 0 : i32
    %c0_i32_0 = arith.constant 0 : i32
    %c0_i32_1 = arith.constant 0 : i32
    return %c0_i32, %arg0, %c0_i32_0 : i32, i32, i32
  }
  func.func @transform_1(%arg0: i32) -> (i32, i32) {
    %c0_i32 = arith.constant 0 : i32
    %c0_i32_0 = arith.constant 0 : i32
    return %arg0, %c0_i32 : i32, i32
  }
  func.func @transform_2(%arg0: i32) -> (i32, i32, i32) {
    %c0_i32 = arith.constant 0 : i32
    %c0_i32_0 = arith.constant 0 : i32
    %c0_i32_1 = arith.constant 0 : i32
    return %arg0, %c0_i32, %c0_i32_0 : i32, i32, i32
  }
}

</mosaic_0001>

<bundles_post_ra>
// kernel: dice_loss.1
= control target key start
LH: loop header
LB: loop body
LE: loop exit
PB: predicated region body
PF: predicated region fallthrough
CT: control target
= control target key end

     0   :  { %v44_v0 = vlaneseq  ;;  %v323_v39 = vmov 0.0   ;;  %vm255_vm4 = vcmask 1040384   ;;  %vm260_vm5 = vcmask 1041408   ;;  %s519_s0 = inlined_call_operand.vmem [shape: f32[2,8,512], index: 0, kind: input, shape index: {}]   ;;  %s520_s1 = inlined_call_operand.vmem [shape: f32[8,512], index: 1, kind: input, shape index: {}]   ;;  %s521_s2 = inlined_call_operand.vmem [shape: f32[1,8,512], index: 2, kind: output, shape index: {}]  }
   0x1   :  { %v11_v1 = vld [vmem:[%s519_s0] sm:$0xff]  ;;  %v12_v2 = vld [vmem:[%s519_s0 + $0x8] sm:$0xff]  ;;  %v13_v3 = vld [vmem:[%s519_s0 + $0x10] sm:$0xff]  ;;  %vm265_vm6 = vcmask 1042432   ;;  %vm270_vm7 = vcmask 1043456   ;;  %vm275_vm8 = vcmask 1044480  }
   0x2   :  { %v14_v4 = vld [vmem:[%s519_s0 + $0x18] sm:$0xff]  ;;  %v298_v5 = vld [vmem:[%s519_s0 + $0x20] sm:$0xff]  ;;  %v299_v6 = vld [vmem:[%s519_s0 + $0x28] sm:$0xff]  ;;  %v24_v7 = vmul.f32 1.442695, %v11_v1  ;;  %v47_v10 = vand.u32 127, %v44_v0 }
   0x3   :  { %v300_v8 = vld [vmem:[%s519_s0 + $0x30] sm:$0xff]  ;;  %v26_v9 = vmul.f32 1.442695, %v12_v2  ;;  %v301_v11 = vld [vmem:[%s519_s0 + $0x38] sm:$0xff]  ;;  %v28_v12 = vmul.f32 1.442695, %v13_v3 }
   0x4   :  { %307 = vpow2.f32 %v24_v7  ;;  %v45_v13 = vshrl.u32 %v44_v0, 7  ;;  %v30_v14 = vmul.f32 1.442695, %v14_v4  ;;  %v32_v15 = vmul.f32 1.442695, %v298_v5  ;;  %v20_v17 = vld [vmem:[%s520_s1] sm:$0xff] }
   0x5   :  { %309 = vpow2.f32 %v26_v9  ;;  %v34_v16 = vmul.f32 1.442695, %v299_v6  ;;  %v36_v18 = vmul.f32 1.442695, %v300_v8  ;;  %v38_v19 = vmul.f32 1.442695, %v301_v11 }
   0x6   :  { %311 = vpow2.f32 %v28_v12  ;;  %v48_v20 = vadd.s32 128, %v47_v10  ;;  %v21_v21 = vld [vmem:[%s520_s1 + $0x8] sm:$0xff]  ;;  %v22_v22 = vld [vmem:[%s520_s1 + $0x10] sm:$0xff]  ;;  %v49_v23 = vadd.s32 256, %v47_v10  ;;  %v50_v24 = vadd.s32 384, %v47_v10  ;;  %v23_v26 = vld [vmem:[%s520_s1 + $0x18] sm:$0xff] }
   0x7   :  { %313 = vpow2.f32 %v30_v14  ;;  %v54_v25 = vmul.u32 512, %v45_v13  ;;  %v40_v27 = vsub.f32 1.0, %v20_v17  ;;  %v41_v33 = vsub.f32 1.0, %v21_v21 }
   0x8   :  { %315 = vpow2.f32 %v32_v15  ;;  %v42_v34 = vsub.f32 1.0, %v22_v22  ;;  %v43_v37 = vsub.f32 1.0, %v23_v26  ;;  %vm280_vm9 = vcmask 1045504  }
   0x9   :  { %317 = vpow2.f32 %v34_v16  ;;  %v55_v29 = vadd.s32 %v54_v25, %v47_v10  ;;  %v56_v30 = vadd.s32 %v54_v25, %v48_v20  ;;  %v57_v31 = vadd.s32 %v54_v25, %v49_v23 }
   0xa   :  { %v308_v28 = vpop.eup %307  ;;  %319 = vpow2.f32 %v36_v18  ;;  %v58_v35 = vadd.s32 %v54_v25, %v50_v24  ;;  %vm285_vm10 = vcmask 1046528  }
   0xb   :  { %v310_v32 = vpop.eup %309  ;;  %321 = vpow2.f32 %v38_v19  ;;  %vm59_vm0 = vcmp.lt.s32.totalorder %v55_v29, 2000  ;;  %vm60_vm1 = vcmp.lt.s32.totalorder %v56_v30, 2000  ;;  %vm61_vm2 = vcmp.lt.s32.totalorder %v57_v31, 2000 }
   0xc   :  { %v312_v36 = vpop.eup %311  ;;  %vm62_vm3 = vcmp.lt.s32.totalorder %v58_v35, 2000  ;;  %v302_v40 = vsel %vm59_vm0, 1.0, %v323_v39  ;;  %v303_v41 = vsel %vm60_vm1, 1.0, %v323_v39  ;;  %v304_v42 = vsel %vm61_vm2, 1.0, %v323_v39 }
   0xd   :  { %v314_v38 = vpop.eup %313  ;;  %v305_v44 = vsel %vm62_vm3, 1.0, %v323_v39  ;;  %v375_v45 = vmul.f32 %v308_v28, %v302_v40  ;;  %v377_v46 = vmul.f32 %v310_v32, %v303_v41  ;;  %v379_v47 = vmul.f32 %v312_v36, %v304_v42 }
   0xe   :  { %v316_v43 = vpop.eup %315  ;;  %v381_v49 = vmul.f32 %v314_v38, %v305_v44  ;;  %v385_v51 = vmul.f32 %v302_v40, %v40_v27  ;;  %v387_v52 = vmul.f32 %v303_v41, %v41_v33  ;;  %v391_v55 = vmul.f32 %v304_v42, %v42_v34 }
   0xf   :  { %v318_v48 = vpop.eup %317  ;;  %v383_v50 = vmul.f32 %v316_v43, %v302_v40  ;;  %v393_v56 = vmul.f32 %v305_v44, %v43_v37  ;;  %v395_v57 = vmul.f32 %v302_v40, %v20_v17  ;;  %v399_v60 = vmul.f32 %v303_v41, %v21_v21 }
  0x10   :  { %v320_v53 = vpop.eup %319  ;;  %v389_v54 = vmul.f32 %v318_v48, %v303_v41  ;;  %v401_v61 = vmul.f32 %v304_v42, %v22_v22  ;;  %v403_v62 = vmul.f32 %v305_v44, %v23_v26  ;;  %v87_v0 = vmul.f32 %v385_v51, %v375_v45 }
  0x11   :  { %v322_v58 = vpop.eup %321  ;;  %v397_v59 = vmul.f32 %v320_v53, %v304_v42  ;;  %v88_v1 = vmul.f32 %v387_v52, %v377_v46  ;;  %v89_v2 = vmul.f32 %v391_v55, %v379_v47  ;;  %v90_v3 = vmul.f32 %v393_v56, %v381_v49 }
  0x12   :  { %v405_v63 = vmul.f32 %v322_v58, %v305_v44  ;;  %v115_v4 = vmul.f32 %v395_v57, %v383_v50  ;;  %v116_v5 = vmul.f32 %v399_v60, %v389_v54  ;;  %v91_v7 = vrot.slane %v87_v0, 4 }
  0x13   :  { %v117_v6 = vmul.f32 %v401_v61, %v397_v59  ;;  %v97_v8 = vrot.slane %v88_v1, 4  ;;  %v103_v9 = vrot.slane %v89_v2, 4  ;;  %v109_v11 = vrot.slane %v90_v3, 4 }
  0x14   :  { %v118_v10 = vmul.f32 %v403_v62, %v405_v63  ;;  %v119_v12 = vrot.slane %v115_v4, 4  ;;  %v125_v13 = vrot.slane %v116_v5, 4  ;;  %v92_v15 = vadd.f32 %v91_v7, %v87_v0 }
  0x15   :  { %v131_v14 = vrot.slane %v117_v6, 4  ;;  %v98_v16 = vadd.f32 %v97_v8, %v88_v1  ;;  %v104_v17 = vadd.f32 %v103_v9, %v89_v2  ;;  %v110_v19 = vadd.f32 %v109_v11, %v90_v3 }
  0x16   :  { %v137_v18 = vrot.slane %v118_v10, 4  ;;  %v120_v20 = vadd.f32 %v119_v12, %v115_v4  ;;  %v126_v21 = vadd.f32 %v125_v13, %v116_v5  ;;  %v93_v23 = vrot.slane %v92_v15, 2 }
  0x17   :  { %v132_v22 = vadd.f32 %v131_v14, %v117_v6  ;;  %v99_v24 = vrot.slane %v98_v16, 2  ;;  %v105_v25 = vrot.slane %v104_v17, 2  ;;  %v111_v27 = vrot.slane %v110_v19, 2 }
  0x18   :  { %v138_v26 = vadd.f32 %v137_v18, %v118_v10  ;;  %v121_v28 = vrot.slane %v120_v20, 2  ;;  %v127_v29 = vrot.slane %v126_v21, 2  ;;  %v94_v31 = vadd.f32 %v93_v23, %v92_v15 }
  0x19   :  { %v133_v30 = vrot.slane %v132_v22, 2  ;;  %v100_v32 = vadd.f32 %v99_v24, %v98_v16  ;;  %v106_v33 = vadd.f32 %v105_v25, %v104_v17  ;;  %v112_v35 = vadd.f32 %v111_v27, %v110_v19 }
  0x1a   :  { %v139_v34 = vrot.slane %v138_v26, 2  ;;  %v122_v36 = vadd.f32 %v121_v28, %v120_v20  ;;  %v128_v37 = vadd.f32 %v127_v29, %v126_v21  ;;  %v95_v39 = vrot.slane %v94_v31, 1 }
  0x1b   :  { %v134_v38 = vadd.f32 %v133_v30, %v132_v22  ;;  %v101_v40 = vrot.slane %v100_v32, 1  ;;  %v107_v41 = vrot.slane %v106_v33, 1  ;;  %v113_v43 = vrot.slane %v112_v35, 1 }
  0x1c   :  { %v140_v42 = vadd.f32 %v139_v34, %v138_v26  ;;  %v123_v44 = vrot.slane %v122_v36, 1  ;;  %v129_v48 = vrot.slane %v128_v37, 1  ;;  %v423_v58 = vadd.f32 %v95_v39, %v94_v31 }
  0x1d   :  { %v135_v53 = vrot.slane %v134_v38, 1  ;;  %v425_v0 = vadd.f32 %v101_v40, %v100_v32  ;;  %v427_v1 = vadd.f32 %v107_v41, %v106_v33  ;;  %v429_v3 = vadd.f32 %v113_v43, %v112_v35 }
  0x1e   :  { %v141_v2 = vrot.slane %v140_v42, 1  ;;  %v431_v4 = vadd.f32 %v123_v44, %v122_v36  ;;  %v433_v5 = vadd.f32 %v129_v48, %v128_v37  ;;  %v143_v8 = vmul.f32 %v375_v45, %v375_v45 }
  0x1f   :  { %v435_v6 = vadd.f32 %v135_v53, %v134_v38  ;;  %v144_v9 = vmul.f32 %v377_v46, %v377_v46  ;;  %v145_v10 = vmul.f32 %v379_v47, %v379_v47  ;;  %v146_v11 = vmul.f32 %v381_v49, %v381_v49 }
  0x20   :  { %v437_v7 = vadd.f32 %v141_v2, %v140_v42  ;;  %v171_v12 = vmul.f32 %v383_v50, %v383_v50  ;;  %v172_v13 = vmul.f32 %v389_v54, %v389_v54  ;;  %v173_v14 = vmul.f32 %v397_v59, %v397_v59 }
  0x21   :  { %v147_v15 = vrot.slane %v143_v8, 4  ;;  %v153_v45 = vrot.slane %v144_v9, 4  ;;  %v159_v16 = vrot.slane %v145_v10, 4  ;;  %v174_v46 = vmul.f32 %v405_v63, %v405_v63 }
  0x22   :  { %v165_v17 = vrot.slane %v146_v11, 4  ;;  %v175_v47 = vrot.slane %v171_v12, 4  ;;  %v181_v18 = vrot.slane %v172_v13, 4  ;;  %v187_v19 = vrot.slane %v173_v14, 4 }
  0x23   :  { %v148_v49 = vadd.f32 %v147_v15, %v143_v8  ;;  %v154_v20 = vadd.f32 %v153_v45, %v144_v9  ;;  %v160_v21 = vadd.f32 %v159_v16, %v145_v10  ;;  %v193_v50 = vrot.slane %v174_v46, 4 }
  0x24   :  { %v166_v22 = vadd.f32 %v165_v17, %v146_v11  ;;  %v176_v23 = vadd.f32 %v175_v47, %v171_v12  ;;  %v182_v54 = vadd.f32 %v181_v18, %v172_v13  ;;  %v188_v24 = vadd.f32 %v187_v19, %v173_v14 }
  0x25   :  { %v149_v25 = vrot.slane %v148_v49, 2  ;;  %v155_v59 = vrot.slane %v154_v20, 2  ;;  %v161_v26 = vrot.slane %v160_v21, 2  ;;  %v194_v27 = vadd.f32 %v193_v50, %v174_v46 }
  0x26   :  { %v167_v28 = vrot.slane %v166_v22, 2  ;;  %v177_v29 = vrot.slane %v176_v23, 2  ;;  %v183_v30 = vrot.slane %v182_v54, 2  ;;  %v189_v63 = vrot.slane %v188_v24, 2 }
  0x27   :  { %v150_v31 = vadd.f32 %v149_v25, %v148_v49  ;;  %v156_v32 = vadd.f32 %v155_v59, %v154_v20  ;;  %v162_v33 = vadd.f32 %v161_v26, %v160_v21  ;;  %v195_v34 = vrot.slane %v194_v27, 2 }
  0x28   :  { %v168_v35 = vadd.f32 %v167_v28, %v166_v22  ;;  %v178_v36 = vadd.f32 %v177_v29, %v176_v23  ;;  %v184_v37 = vadd.f32 %v183_v30, %v182_v54  ;;  %v190_v38 = vadd.f32 %v189_v63, %v188_v24 }
  0x29   :  { %v151_v39 = vrot.slane %v150_v31, 1  ;;  %v157_v40 = vrot.slane %v156_v32, 1  ;;  %v163_v41 = vrot.slane %v162_v33, 1  ;;  %v196_v42 = vadd.f32 %v195_v34, %v194_v27 }
  0x2a   :  { %v169_v43 = vrot.slane %v168_v35, 1  ;;  %v179_v44 = vrot.slane %v178_v36, 1  ;;  %v185_v48 = vrot.slane %v184_v37, 1  ;;  %v191_v53 = vrot.slane %v190_v38, 1 }
  0x2b   :  { %v455_v2 = vadd.f32 %v151_v39, %v150_v31  ;;  %v457_v8 = vadd.f32 %v157_v40, %v156_v32  ;;  %v459_v9 = vadd.f32 %v163_v41, %v162_v33  ;;  %v197_v10 = vrot.slane %v196_v42, 1 }
  0x2c   :  { %v461_v11 = vadd.f32 %v169_v43, %v168_v35  ;;  %v463_v12 = vadd.f32 %v179_v44, %v178_v36  ;;  %v465_v13 = vadd.f32 %v185_v48, %v184_v37  ;;  %v467_v14 = vadd.f32 %v191_v53, %v190_v38 }
  0x2d   :  { %v469_v15 = vadd.f32 %v197_v10, %v196_v42  ;;  %v199_v45 = vmul.f32 %v385_v51, %v385_v51  ;;  %v200_v16 = vmul.f32 %v387_v52, %v387_v52  ;;  %v201_v46 = vmul.f32 %v391_v55, %v391_v55 }
  0x2e   :  { %v202_v17 = vmul.f32 %v393_v56, %v393_v56  ;;  %v227_v47 = vmul.f32 %v395_v57, %v395_v57  ;;  %v228_v18 = vmul.f32 %v399_v60, %v399_v60  ;;  %v229_v19 = vmul.f32 %v401_v61, %v401_v61 }
  0x2f   :  { %v203_v49 = vrot.slane %v199_v45, 4  ;;  %v209_v51 = vrot.slane %v200_v16, 4  ;;  %v215_v20 = vrot.slane %v201_v46, 4  ;;  %v230_v52 = vmul.f32 %v403_v62, %v403_v62 }
  0x30   :  { %v221_v21 = vrot.slane %v202_v17, 4  ;;  %v231_v55 = vrot.slane %v227_v47, 4  ;;  %v237_v50 = vrot.slane %v228_v18, 4  ;;  %v243_v22 = vrot.slane %v229_v19, 4 }
  0x31   :  { %v204_v56 = vadd.f32 %v203_v49, %v199_v45  ;;  %v210_v23 = vadd.f32 %v209_v51, %v200_v16  ;;  %v216_v54 = vadd.f32 %v215_v20, %v201_v46  ;;  %v249_v57 = vrot.slane %v230_v52, 4 }
  0x32   :  { %v222_v24 = vadd.f32 %v221_v21, %v202_v17  ;;  %v232_v25 = vadd.f32 %v231_v55, %v227_v47  ;;  %v238_v60 = vadd.f32 %v237_v50, %v228_v18  ;;  %v244_v59 = vadd.f32 %v243_v22, %v229_v19 }
  0x33   :  { %v205_v26 = vrot.slane %v204_v56, 2  ;;  %v211_v61 = vrot.slane %v210_v23, 2  ;;  %v217_v27 = vrot.slane %v216_v54, 2  ;;  %v250_v28 = vadd.f32 %v249_v57, %v230_v52 }
  0x34   :  { %v223_v29 = vrot.slane %v222_v24, 2  ;;  %v233_v30 = vrot.slane %v232_v25, 2  ;;  %v239_v63 = vrot.slane %v238_v60, 2  ;;  %v245_v62 = vrot.slane %v244_v59, 2 }
  0x35   :  { %v206_v31 = vadd.f32 %v205_v26, %v204_v56  ;;  %v212_v32 = vadd.f32 %v211_v61, %v210_v23  ;;  %v218_v33 = vadd.f32 %v217_v27, %v216_v54  ;;  %v251_v34 = vrot.slane %v250_v28, 2 }
  0x36   :  { %v224_v35 = vadd.f32 %v223_v29, %v222_v24  ;;  %v234_v36 = vadd.f32 %v233_v30, %v232_v25  ;;  %v240_v37 = vadd.f32 %v239_v63, %v238_v60  ;;  %v246_v38 = vadd.f32 %v245_v62, %v244_v59 }
  0x37   :  { %v207_v39 = vrot.slane %v206_v31, 1  ;;  %v213_v40 = vrot.slane %v212_v32, 1  ;;  %v219_v41 = vrot.slane %v218_v33, 1  ;;  %v252_v42 = vadd.f32 %v251_v34, %v250_v28 }
  0x38   :  { %v225_v43 = vrot.slane %v224_v35, 1  ;;  %v235_v44 = vrot.slane %v234_v36, 1  ;;  %v241_v48 = vrot.slane %v240_v37, 1  ;;  %v247_v53 = vrot.slane %v246_v38, 1 }
  0x39   :  { %v208_v10 = vadd.f32 %v207_v39, %v206_v31  ;;  %v214_v45 = vadd.f32 %v213_v40, %v212_v32  ;;  %v220_v16 = vadd.f32 %v219_v41, %v218_v33  ;;  %v253_v46 = vrot.slane %v252_v42, 1 }
  0x3a   :  { %v226_v17 = vadd.f32 %v225_v43, %v224_v35  ;;  %v236_v47 = vadd.f32 %v235_v44, %v234_v36  ;;  %v242_v18 = vadd.f32 %v241_v48, %v240_v37  ;;  %v248_v19 = vadd.f32 %v247_v53, %v246_v38 }
  0x3b   :  { %v254_v49 = vadd.f32 %v253_v46, %v252_v42  ;;  %v256_v51 = vsel %vm255_vm4, %v423_v58, %v431_v4  ;;  %v257_v20 = vsel %vm255_vm4, %v425_v0, %v433_v5  ;;  %v258_v52 = vsel %vm255_vm4, %v427_v1, %v435_v6 }
  0x3c   :  { %v259_v21 = vsel %vm255_vm4, %v429_v3, %v437_v7  ;;  %v261_v55 = vsel %vm260_vm5, %v256_v51, %v455_v2  ;;  %v262_v50 = vsel %vm260_vm5, %v257_v20, %v457_v8  ;;  %v263_v22 = vsel %vm260_vm5, %v258_v52, %v459_v9 }
  0x3d   :  { %v264_v56 = vsel %vm260_vm5, %v259_v21, %v461_v11  ;;  %v266_v23 = vsel %vm265_vm6, %v261_v55, %v463_v12  ;;  %v267_v58 = vsel %vm265_vm6, %v262_v50, %v465_v13  ;;  %v268_v0 = vsel %vm265_vm6, %v263_v22, %v467_v14 }
  0x3e   :  { %v269_v4 = vsel %vm265_vm6, %v264_v56, %v469_v15  ;;  %v271_v1 = vsel %vm270_vm7, %v266_v23, %v208_v10  ;;  %v272_v3 = vsel %vm270_vm7, %v267_v58, %v214_v45  ;;  %v273_v5 = vsel %vm270_vm7, %v268_v0, %v220_v16 }
  0x3f   :  { %v274_v6 = vsel %vm270_vm7, %v269_v4, %v226_v17  ;;  %v276_v7 = vsel %vm275_vm8, %v271_v1, %v236_v47  ;;  %v277_v2 = vsel %vm275_vm8, %v272_v3, %v242_v18  ;;  %v278_v8 = vsel %vm275_vm8, %v273_v5, %v248_v19 }
  0x40   :  { %v279_v9 = vsel %vm275_vm8, %v274_v6, %v254_v49  ;;  %v281_v11 = vsel %vm280_vm9, %v276_v7, 0.0  ;;  %v282_v12 = vsel %vm280_vm9, %v277_v2, 0.0  ;;  %v283_v54 = vsel %vm280_vm9, %v278_v8, 0.0 }
  0x41   :  { %v284_v13 = vsel %vm280_vm9, %v279_v9, 0.0  ;;  %v286_v14 = vsel %vm285_vm10, %v281_v11, 0.0  ;;  %v287_v15 = vsel %vm285_vm10, %v282_v12, 0.0  ;;  %v288_v57 = vsel %vm285_vm10, %v283_v54, 0.0 }
  0x42   :  { %v289_v24 = vsel %vm285_vm10, %v284_v13, 0.0  ;;  %290 = vst [vmem:[%s521_s2] sm:$0xff] %v286_v14 }
  0x43   :  { %291 = vst [vmem:[%s521_s2 + $0x8] sm:$0xff] %v287_v15 }
  0x44   :  { %292 = vst [vmem:[%s521_s2 + $0x10] sm:$0xff] %v288_v57 }
  0x45   :  { %293 = vst [vmem:[%s521_s2 + $0x18] sm:$0xff] %v289_v24 }

</bundles_post_ra>
